<compile_context>
chip_gen: v7x
topology: tpu7x:2x2x1
jax: 0.10.0
libtpu: 0.0.40
codegen_flags: <defaults>
</compile_context>

<pallas_src>
import functools
import math

import jax
import jax.numpy as jnp
from jax import lax
from jax.experimental import pallas as pl
from jax.experimental.pallas import tpu as pltpu

LANES = 128          # lane width (last dim)
SUB = 8              # sublane multiple
TM_MAX = 2048        # rows per tile -> 2048*128*4 B = 1 MiB / input / block
FOLD_CHUNK = 256     # rows folded per loop step (bounds vreg live range)
_LOG2 = math.log(2.0)


def _num_tensorcores():
    """Best-effort TensorCores-per-chip (2 on v7x, 1 on v5e/v6e)."""
    try:
        info = pltpu.get_tpu_info()
        for attr in ("num_tensorcores", "tensorcores_per_chip", "num_cores",
                     "core_count"):
            v = getattr(info, attr, None)
            if isinstance(v, int) and v >= 1:
                return v
    except Exception:
        pass
    try:
        kind = jax.devices()[0].device_kind.lower()
        if "v7" in kind:
            return 2
    except Exception:
        pass
    return 1


_NUM_TC = _num_tensorcores()


def _logcosh_kernel(x_ref, y_ref, o_ref, *, tm, chunk, t_per, rows, need_mask):
    """Accumulate sum(|d| + log1p(exp(-2|d|))) of this (tm,128) tile into o_ref.

    The per-element -log(2) is hoisted to the wrapper.
    """
    p = pl.program_id(0)
    t = pl.program_id(1)

    # Logical tile index; for a duplicated tail tile of the parallel split it
    # exceeds the real tile count and every row is masked out below.
    tile_idx = p * t_per + t
    row_start = tile_idx * tm

    n_chunks = tm // chunk

    def body(i, acc):
        r0 = pl.multiple_of(i * chunk, chunk)
        xd = x_ref[pl.ds(r0, chunk), :].astype(jnp.float32)
        yd = y_ref[pl.ds(r0, chunk), :].astype(jnp.float32)
        a = jnp.abs(xd - yd)
        # stable log(cosh(d)) + log(2) = |d| + log1p(exp(-2|d|))
        lc = a + jnp.log1p(jnp.exp(-2.0 * a))
        if need_mask:
            # Row-only validity test: the kernel only sees the 1024-aligned
            # prefix, so every lane of a valid row is valid.  No int32
            # overflow (compares row indices, not element indices).
            rid = row_start + r0 + lax.broadcasted_iota(
                jnp.int32, (chunk, LANES), 0)
            lc = jnp.where(rid < rows, lc, 0.0)
        # VPU-only sublane fold of the chunk into an (8,128) vreg partial.
        return acc + jnp.sum(lc.reshape(chunk // SUB, SUB, LANES), axis=0)

    unroll = True if n_chunks <= 8 else 8
    folded = lax.fori_loop(0, n_chunks, body,
                           jnp.zeros((SUB, LANES), jnp.float32),
                           unroll=unroll)

    @pl.when(t == 0)
    def _():
        o_ref[...] = folded

    @pl.when(t > 0)
    def _():
        o_ref[...] += folded


@functools.partial(jax.jit, static_argnames=("tm_max",))
def logcosh_loss(x, y, *, tm_max=TM_MAX):
    assert x.shape == y.shape
    xf = x.reshape(-1)
    yf = y.reshape(-1)
    n = int(xf.shape[0])

    block = SUB * LANES                      # 1024 elements
    n_prefix = (n // block) * block
    total = jnp.zeros((), jnp.float32)

    # <=1023-element tail handled with plain jnp (no full-array pad copies).
    if n_prefix != n:
        dt = xf[n_prefix:].astype(jnp.float32) - yf[n_prefix:].astype(jnp.float32)
        at = jnp.abs(dt)
        total = total + jnp.sum(at + jnp.log1p(jnp.exp(-2.0 * at)) - _LOG2)

    if n_prefix:
        x2 = xf[:n_prefix].reshape(-1, LANES)
        y2 = yf[:n_prefix].reshape(-1, LANES)
        rows = x2.shape[0]                   # multiple of 8

        tm = min(tm_max, rows)
        n_tiles = -(-rows // tm)
        # Split the reduction across TensorCores only where it pays (v7x).
        n_partials = 2 if (_NUM_TC >= 2 and n_tiles >= 2) else 1
        t_per = -(-n_tiles // n_partials)

        # Mask is only emitted when a tile over-reads (partial last tile or a
        # clamped duplicate tile of the 2-way split).
        need_mask = (rows % tm != 0) or (n_partials * t_per != n_tiles)

        if tm % FOLD_CHUNK == 0:
            chunk = FOLD_CHUNK
        elif tm % 64 == 0:
            chunk = 64
        else:
            chunk = SUB                      # tm is always a multiple of 8

        def in_map(p, t):
            # Clamp duplicated tail tiles of the parallel split to a valid
            # block index; their contribution is masked to zero in-kernel.
            return (jnp.minimum(p * t_per + t, n_tiles - 1), 0)

        kernel = functools.partial(
            _logcosh_kernel, tm=tm, chunk=chunk, t_per=t_per, rows=rows,
            need_mask=need_mask)

        itemsize = x2.dtype.itemsize
        cost = pl.CostEstimate(
            flops=6 * n_prefix,
            transcendentals=2 * n_prefix,
            bytes_accessed=2 * n_prefix * itemsize + n_partials * SUB * LANES * 4,
        )

        partials = pl.pallas_call(
            kernel,
            out_shape=jax.ShapeDtypeStruct((n_partials * SUB, LANES),
                                           jnp.float32),
            grid_spec=pltpu.PrefetchScalarGridSpec(
                num_scalar_prefetch=0,
                grid=(n_partials, t_per),
                in_specs=[
                    pl.BlockSpec((tm, LANES), in_map),
                    pl.BlockSpec((tm, LANES), in_map),
                ],
                out_specs=pl.BlockSpec((SUB, LANES), lambda p, t: (p, 0)),
            ),
            compiler_params=pltpu.CompilerParams(
                dimension_semantics=("parallel", "arbitrary"),
                vmem_limit_bytes=32 * 1024 * 1024,
            ),
            cost_estimate=cost,
        )(x2, y2)

        # The -log(2) per element was hoisted out of the kernel.
        total = total + (jnp.sum(partials) - n_prefix * _LOG2)

    return total


if __name__ == "__main__":
    key = jax.random.PRNGKey(0)
    kx, ky = jax.random.split(key)

    # small shapes consistent with an elementwise loss over e.g. NCHW tensors
    shape = (2, 4, 16, 16)
    x = jax.random.normal(kx, shape, dtype=jnp.float32)
    y = jax.random.normal(ky, shape, dtype=jnp.float32)

    loss = logcosh_loss(x, y)
    jax.block_until_ready(loss)
    ref = jnp.sum(jnp.log(jnp.cosh(x - y)))
    assert jnp.allclose(loss, ref, rtol=1e-4, atol=1e-4), (loss, ref)

    # unaligned element count -> exercises the wrapper tail path
    xs = jax.random.normal(kx, (3, 5, 7, 11), dtype=jnp.float32)
    ys = jax.random.normal(ky, (3, 5, 7, 11), dtype=jnp.float32)
    loss2 = logcosh_loss(xs, ys)
    ref2 = jnp.sum(jnp.log(jnp.cosh(xs - ys)))
    assert jnp.allclose(loss2, ref2, rtol=1e-4, atol=1e-4), (loss2, ref2)

    # multi-tile grid with a partial last tile -> exercises the in-kernel mask
    xm = jax.random.normal(kx, (3, 1024), dtype=jnp.float32)
    ym = jax.random.normal(ky, (3, 1024), dtype=jnp.float32)
    loss3 = logcosh_loss(xm, ym, tm_max=16)
    ref3 = jnp.sum(jnp.log(jnp.cosh(xm - ym)))
    assert jnp.allclose(loss3, ref3, rtol=1e-4, atol=1e-4), (loss3, ref3)

    jax.block_until_ready((loss, loss2, loss3))
    print("KERNEL_OK")
</pallas_src>

<mosaic_0001>
module attributes {stable_mosaic.version = 11 : i64} {
  func.func @_logcosh_kernel(%arg0: i32, %arg1: i32, %arg2: memref<16x128xf32, #tpu.memory_space<vmem>>, %arg3: memref<16x128xf32, #tpu.memory_space<vmem>>, %arg4: memref<8x128xf32, #tpu.memory_space<vmem>>) attributes {dimension_semantics = [#tpu.dimension_semantics<parallel>, #tpu.dimension_semantics<arbitrary>], iteration_bounds = array<i64: 1, 1>, scalar_prefetch = 0 : i64, scratch_operands = 0 : i64, tpu.core_type = #tpu.core_type<tc>, window_params = [{transform_indices = @transform_0, window_bounds = array<i64: 16, 128>}, {transform_indices = @transform_1, window_bounds = array<i64: 16, 128>}, {transform_indices = @transform_2, window_bounds = array<i64: 8, 128>}]} {
    %cst = arith.constant 0.000000e+00 : f32
    %0 = vector.broadcast %cst : f32 to vector<8x128xf32>
    %c0_i32 = arith.constant 0 : i32
    %c8_i32 = arith.constant 8 : i32
    %1 = arith.muli %c0_i32, %c8_i32 : i32
    %2 = tpu.assume_multiple %1, 8 : i32
    %3 = arith.index_cast %2 : i32 to index
    %c0 = arith.constant 0 : index
    %4 = vector.load %arg2[%3, %c0] : memref<16x128xf32, #tpu.memory_space<vmem>>, vector<8x128xf32>
    %5 = arith.index_cast %2 : i32 to index
    %c0_0 = arith.constant 0 : index
    %6 = vector.load %arg3[%5, %c0_0] : memref<16x128xf32, #tpu.memory_space<vmem>>, vector<8x128xf32>
    %7 = arith.subf %4, %6 : vector<8x128xf32>
    %8 = math.absf %7 : vector<8x128xf32>
    %cst_1 = arith.constant -2.000000e+00 : f32
    %9 = vector.broadcast %cst_1 : f32 to vector<8x128xf32>
    %10 = arith.mulf %9, %8 : vector<8x128xf32>
    %11 = math.exp %10 : vector<8x128xf32>
    %12 = math.log1p %11 : vector<8x128xf32>
    %13 = arith.addf %8, %12 : vector<8x128xf32>
    %14 = vector.shape_cast %13 : vector<8x128xf32> to vector<1x8x128xf32>
    %cst_2 = arith.constant dense<0.000000e+00> : vector<8x128xf32>
    %15 = vector.multi_reduction <add>, %14, %cst_2 [0] : vector<1x8x128xf32> to vector<8x128xf32>
    %16 = arith.addf %0, %15 : vector<8x128xf32>
    %c1_i32 = arith.constant 1 : i32
    %c8_i32_3 = arith.constant 8 : i32
    %17 = arith.muli %c1_i32, %c8_i32_3 : i32
    %18 = tpu.assume_multiple %17, 8 : i32
    %19 = arith.index_cast %18 : i32 to index
    %c0_4 = arith.constant 0 : index
    %20 = vector.load %arg2[%19, %c0_4] : memref<16x128xf32, #tpu.memory_space<vmem>>, vector<8x128xf32>
    %21 = arith.index_cast %18 : i32 to index
    %c0_5 = arith.constant 0 : index
    %22 = vector.load %arg3[%21, %c0_5] : memref<16x128xf32, #tpu.memory_space<vmem>>, vector<8x128xf32>
    %23 = arith.subf %20, %22 : vector<8x128xf32>
    %24 = math.absf %23 : vector<8x128xf32>
    %cst_6 = arith.constant -2.000000e+00 : f32
    %25 = vector.broadcast %cst_6 : f32 to vector<8x128xf32>
    %26 = arith.mulf %25, %24 : vector<8x128xf32>
    %27 = math.exp %26 : vector<8x128xf32>
    %28 = math.log1p %27 : vector<8x128xf32>
    %29 = arith.addf %24, %28 : vector<8x128xf32>
    %30 = vector.shape_cast %29 : vector<8x128xf32> to vector<1x8x128xf32>
    %cst_7 = arith.constant dense<0.000000e+00> : vector<8x128xf32>
    %31 = vector.multi_reduction <add>, %30, %cst_7 [0] : vector<1x8x128xf32> to vector<8x128xf32>
    %32 = arith.addf %16, %31 : vector<8x128xf32>
    %c2_i32 = arith.constant 2 : i32
    %c0_i32_8 = arith.constant 0 : i32
    %33 = arith.cmpi eq, %arg1, %c0_i32_8 : i32
    %34 = arith.extui %33 : i1 to i32
    %c0_i32_9 = arith.constant 0 : i32
    %35 = arith.cmpi ne, %34, %c0_i32_9 : i32
    scf.if %35 {
      %c0_12 = arith.constant 0 : index
      %c0_13 = arith.constant 0 : index
      %39 = vector.load %arg4[%c0_12, %c0_13] : memref<8x128xf32, #tpu.memory_space<vmem>>, vector<8x128xf32>
      tpu.vector_store %arg4[%c0_12, %c0_13], %32 {strides = array<i32>} : memref<8x128xf32, #tpu.memory_space<vmem>>, vector<8x128xf32>,
    } else {
    }
    %c0_i32_10 = arith.constant 0 : i32
    %36 = arith.cmpi sgt, %arg1, %c0_i32_10 : i32
    %37 = arith.extui %36 : i1 to i32
    %c0_i32_11 = arith.constant 0 : i32
    %38 = arith.cmpi ne, %37, %c0_i32_11 : i32
    scf.if %38 {
      %c0_12 = arith.constant 0 : index
      %c0_13 = arith.constant 0 : index
      %39 = vector.load %arg4[%c0_12, %c0_13] : memref<8x128xf32, #tpu.memory_space<vmem>>, vector<8x128xf32>
      %40 = arith.addf %39, %32 : vector<8x128xf32>
      %c0_14 = arith.constant 0 : index
      %c0_15 = arith.constant 0 : index
      %41 = vector.load %arg4[%c0_14, %c0_15] : memref<8x128xf32, #tpu.memory_space<vmem>>, vector<8x128xf32>
      tpu.vector_store %arg4[%c0_14, %c0_15], %40 {strides = array<i32>} : memref<8x128xf32, #tpu.memory_space<vmem>>, vector<8x128xf32>,
    } else {
    }
    return
  }
  func.func @transform_0(%arg0: i32, %arg1: i32) -> (i32, i32) {
    %c1_i32 = arith.constant 1 : i32
    %0 = arith.muli %arg0, %c1_i32 : i32
    %1 = arith.addi %0, %arg1 : i32
    %c0_i32 = arith.constant 0 : i32
    %2 = arith.minsi %1, %c0_i32 : i32
    %c0_i32_0 = arith.constant 0 : i32
    %c0_i32_1 = arith.constant 0 : i32
    return %2, %c0_i32_0 : i32, i32
  }
  func.func @transform_1(%arg0: i32, %arg1: i32) -> (i32, i32) {
    %c1_i32 = arith.constant 1 : i32
    %0 = arith.muli %arg0, %c1_i32 : i32
    %1 = arith.addi %0, %arg1 : i32
    %c0_i32 = arith.constant 0 : i32
    %2 = arith.minsi %1, %c0_i32 : i32
    %c0_i32_0 = arith.constant 0 : i32
    %c0_i32_1 = arith.constant 0 : i32
    return %2, %c0_i32_0 : i32, i32
  }
  func.func @transform_2(%arg0: i32, %arg1: i32) -> (i32, i32) {
    %c0_i32 = arith.constant 0 : i32
    %c0_i32_0 = arith.constant 0 : i32
    return %arg0, %c0_i32 : i32, i32
  }
}

</mosaic_0001>

<bundles_post_ra>
// kernel: logcosh_loss.1
= control target key start
LH: loop header
LB: loop body
LE: loop exit
PB: predicated region body
PF: predicated region fallthrough
CT: control target
= control target key end

     0   :  { %s183_s0 = inlined_call_operand.vmem [shape: f32[16,128], index: 0, kind: input, shape index: {}]   ;;  %s184_s1 = inlined_call_operand.vmem [shape: f32[16,128], index: 1, kind: input, shape index: {}]   ;;  %s185_s2 = inlined_call_operand.vmem [shape: f32[8,128], index: 2, kind: output, shape index: {}]  }
   0x1   :  { %v75_v0 = vld [vmem:[%s183_s0] sm:$0xff]  ;;  %v143_v2 = vld [vmem:[%s183_s0 + $0x8] sm:$0xff] }
   0x2   :  { %v76_v1 = vld [vmem:[%s184_s1] sm:$0xff]  ;;  %v144_v4 = vld [vmem:[%s184_s1 + $0x8] sm:$0xff] }
   0x3   :  { %v77_v3 = vsub.f32 %v75_v0, %v76_v1  ;;  %v98_v5 = vsub.f32 %v143_v2, %v144_v4 }
   0x5   :  { %v78_v6 = vand.u32 2147483647, %v77_v3  ;;  %v99_v7 = vand.u32 2147483647, %v98_v5 }
   0x7   :  { %v79_v8 = vmul.f32 -2.0, %v78_v6  ;;  %v100_v9 = vmul.f32 -2.0, %v99_v7 }
   0x9   :  { %v80_v10 = vmul.f32 1.442695, %v79_v8  ;;  %v101_v11 = vmul.f32 1.442695, %v100_v9 }
   0xb   :  { %145 = vpow2.f32 %v80_v10 }
   0xc   :  { %147 = vpow2.f32 %v101_v11 }
  0x15   :  { %v146_v12 = vpop.eup %145 }
  0x16   :  { %v148_v13 = vpop.eup %147  ;;  %v82_v14 = vadd.f32 1.0, %v146_v12  ;;  %v85_v16 = vmul.f32 -0.5, %v146_v12  ;;  %v88_v19 = vand.u32 2147483647, %v146_v12 }
  0x17   :  { %v103_v15 = vadd.f32 1.0, %v148_v13  ;;  %v106_v17 = vmul.f32 -0.5, %v148_v13  ;;  %v109_v21 = vand.u32 2147483647, %v148_v13 }
  0x18   :  { %149 = vlog2.f32 %v82_v14  ;;  %v86_v18 = vadd.f32 1.0, %v85_v16  ;;  %vm89_vm0 = vcmp.lt.f32.partialorder %v88_v19, 0.0004427343 }
  0x19   :  { %151 = vlog2.f32 %v103_v15  ;;  %v107_v20 = vadd.f32 1.0, %v106_v17  ;;  %vm110_vm1 = vcmp.lt.f32.partialorder %v109_v21, 0.0004427343 }
  0x1a   :  { %v87_v22 = vmul.f32 %v146_v12, %v86_v18 }
  0x1b   :  { %v108_v24 = vmul.f32 %v148_v13, %v107_v20 }
  0x22   :  { %v150_v23 = vpop.eup %149 }
  0x23   :  { %v152_v25 = vpop.eup %151  ;;  %v84_v26 = vmul.f32 0.6931472, %v150_v23 }
  0x24   :  { %v105_v27 = vmul.f32 0.6931472, %v152_v25 }
  0x25   :  { %v90_v28 = vsel %vm89_vm0, %v87_v22, %v84_v26 }
  0x26   :  { %v91_v29 = vadd.f32 %v90_v28, %v78_v6  ;;  %v111_v30 = vsel %vm110_vm1, %v108_v24, %v105_v27 }
  0x27   :  { %v112_v31 = vadd.f32 %v111_v30, %v99_v7 }
  0x29   :  { %v114_v32 = vadd.f32 %v112_v31, %v91_v29 }
  0x2b   :  { %119 = vst [vmem:[%s185_s2] sm:$0xff] %v114_v32 }

</bundles_post_ra>
